<compile_context>
chip_gen: v5e
topology: v5e:2x2
jax: 0.10.0
libtpu: 0.0.40
codegen_flags: <defaults>
</compile_context>

<pallas_src>
import math
import jax
import jax.numpy as jnp
from jax.experimental import pallas as pl
from jax.experimental.pallas import tpu as pltpu


def _make_norm_kernel(eps: float, n_features: int):
    def norm_kernel(x_ref, alpha_ref, bias_ref, o_ref):
        # x_ref: (tile_rows, F) block in VMEM
        x = x_ref[...].astype(jnp.float32)
        mean = jnp.mean(x, axis=-1, keepdims=True)
        d = x - mean
        # Unbiased variance (divide by N-1), as in torch.std.
        # NOTE: n_features == 1 yields 0/0 -> NaN, same as PyTorch.
        var = jnp.sum(d * d, axis=-1, keepdims=True) / (n_features - 1)
        std = jnp.sqrt(var)
        denom = std + eps                      # (tile_rows, 1)
        inv = pl.reciprocal(denom, approx=True)
        inv = inv * (2.0 - denom * inv)        # one Newton step -> f32 accuracy
        alpha = alpha_ref[...].astype(jnp.float32)   # (1, F)
        bias = bias_ref[...].astype(jnp.float32)     # (1, F)
        y = (alpha * d) * inv + bias
        o_ref[...] = y.astype(o_ref.dtype)

    return norm_kernel


def _choose_tile_rows(rows: int, n_features: int, itemsize: int,
                      max_block_bytes: int) -> int:
    """Largest row tile that (a) is a multiple of 8, (b) divides rows, and
    (c) keeps one block under ~max_block_bytes.  Falls back to a single
    full-rows block when rows is not a multiple of 8 (block shape equal to
    the full array dim is always valid)."""
    if rows <= 0:
        return 1
    cap = max(8, max_block_bytes // max(1, n_features * itemsize))
    cap = min(cap, rows)
    if rows % 8 != 0:
        # TODO(synk): for very large, non-multiple-of-8 row counts this single
        # block could exceed VMEM; acceptable robustness limit here.
        return rows
    cap = max(8, (cap // 8) * 8)
    for t in range(cap, 7, -8):
        if rows % t == 0:
            return t
    return 8


def normalization_layer(x, alpha, bias, eps: float = 1e-6,
                        max_block_bytes: int = 4 << 20):
    """Pallas TPU NormalizationLayer.forward.

    x:     (..., features)
    alpha: (features,)
    bias:  (features,)
    """
    orig_shape = x.shape
    n_features = orig_shape[-1]
    rows = math.prod(orig_shape[:-1])
    x2 = x.reshape(rows, n_features)

    tile_rows = _choose_tile_rows(rows, n_features, x2.dtype.itemsize,
                                  max_block_bytes)
    grid = (rows // tile_rows,)

    alpha2 = alpha.reshape(1, n_features)
    bias2 = bias.reshape(1, n_features)

    kernel = _make_norm_kernel(eps, n_features)

    out = pl.pallas_call(
        kernel,
        out_shape=jax.ShapeDtypeStruct((rows, n_features), x.dtype),
        grid_spec=pltpu.PrefetchScalarGridSpec(
            num_scalar_prefetch=0,
            grid=grid,
            in_specs=[
                pl.BlockSpec((tile_rows, n_features), lambda i: (i, 0)),
                pl.BlockSpec((1, n_features), lambda i: (0, 0)),
                pl.BlockSpec((1, n_features), lambda i: (0, 0)),
            ],
            out_specs=pl.BlockSpec((tile_rows, n_features), lambda i: (i, 0)),
        ),
        compiler_params=pltpu.CompilerParams(
            dimension_semantics=("parallel",),
            vmem_limit_bytes=64 << 20,
        ),
    )(x2, alpha2, bias2)

    return out.reshape(orig_shape)


def _reference(x, alpha, bias, eps=1e-6):
    mean = jnp.mean(x, axis=-1, keepdims=True)
    d = x - mean
    var = jnp.sum(d * d, axis=-1, keepdims=True) / (x.shape[-1] - 1)
    std = jnp.sqrt(var)
    return alpha * d / (std + eps) + bias


if __name__ == "__main__":
    key = jax.random.PRNGKey(0)

    # Demo shape matching the PyTorch module usage: (batch, seq, features)
    batch, seq, features = 2, 8, 32
    x = jax.random.normal(key, (batch, seq, features), dtype=jnp.float32)
    # nn.Parameter(torch.ones(features)) / torch.zeros(features)
    alpha = jnp.ones((features,), dtype=jnp.float32)
    bias = jnp.zeros((features,), dtype=jnp.float32)

    out = normalization_layer(x, alpha, bias)
    out = jax.block_until_ready(out)

    ref = _reference(x, alpha, bias)
    assert out.shape == x.shape
    assert jnp.allclose(out, ref, atol=1e-5, rtol=1e-5), "mismatch vs reference"

    # Extra check exercising a multi-step grid (small max_block_bytes forces
    # tile_rows=8 -> 64 grid steps) to validate the tiled path.
    k2 = jax.random.PRNGKey(1)
    x2 = jax.random.normal(k2, (4, 128, 256), dtype=jnp.float32)
    a2 = jax.random.normal(jax.random.PRNGKey(2), (256,), dtype=jnp.float32)
    b2 = jax.random.normal(jax.random.PRNGKey(3), (256,), dtype=jnp.float32)
    out2 = jax.block_until_ready(
        normalization_layer(x2, a2, b2, max_block_bytes=8 * 256 * 4))
    ref2 = _reference(x2, a2, b2)
    assert jnp.allclose(out2, ref2, atol=1e-4, rtol=1e-4), "tiled mismatch"

    print("KERNEL_OK")
</pallas_src>

<mosaic_0001>
module attributes {stable_mosaic.version = 11 : i64} {
  func.func @norm_kernel(%arg0: i32, %arg1: memref<16x32xf32, #tpu.memory_space<vmem>>, %arg2: memref<1x32xf32, #tpu.memory_space<vmem>>, %arg3: memref<1x32xf32, #tpu.memory_space<vmem>>, %arg4: memref<16x32xf32, #tpu.memory_space<vmem>>) attributes {dimension_semantics = [#tpu.dimension_semantics<parallel>], iteration_bounds = array<i64: 1>, scalar_prefetch = 0 : i64, scratch_operands = 0 : i64, tpu.core_type = #tpu.core_type<tc>, window_params = [{transform_indices = @transform_0, window_bounds = array<i64: 16, 32>}, {pipeline_mode = #tpu.pipeline_mode<synchronous>, transform_indices = @transform_1, window_bounds = array<i64: 1, 32>}, {pipeline_mode = #tpu.pipeline_mode<synchronous>, transform_indices = @transform_2, window_bounds = array<i64: 1, 32>}, {transform_indices = @transform_3, window_bounds = array<i64: 16, 32>}]} {
    %c0 = arith.constant 0 : index
    %c0_0 = arith.constant 0 : index
    %0 = vector.load %arg1[%c0, %c0_0] : memref<16x32xf32, #tpu.memory_space<vmem>>, vector<16x32xf32>
    %cst = arith.constant dense<0.000000e+00> : vector<16xf32>
    %1 = vector.multi_reduction <add>, %0, %cst [1] : vector<16x32xf32> to vector<16xf32>
    %2 = vector.shape_cast %1 : vector<16xf32> to vector<16x1xf32>
    %cst_1 = arith.constant 3.200000e+01 : f32
    %3 = vector.broadcast %cst_1 : f32 to vector<16x1xf32>
    %4 = arith.divf %2, %3 : vector<16x1xf32>
    %5 = vector.broadcast %4 : vector<16x1xf32> to vector<16x32xf32>
    %6 = arith.subf %0, %5 : vector<16x32xf32>
    %7 = arith.mulf %6, %6 : vector<16x32xf32>
    %cst_2 = arith.constant dense<0.000000e+00> : vector<16xf32>
    %8 = vector.multi_reduction <add>, %7, %cst_2 [1] : vector<16x32xf32> to vector<16xf32>
    %9 = vector.shape_cast %8 : vector<16xf32> to vector<16x1xf32>
    %cst_3 = arith.constant 3.100000e+01 : f32
    %10 = vector.broadcast %cst_3 : f32 to vector<16x1xf32>
    %11 = arith.divf %9, %10 : vector<16x1xf32>
    %12 = math.sqrt %11 : vector<16x1xf32>
    %cst_4 = arith.constant 9.99999997E-7 : f32
    %13 = vector.broadcast %cst_4 : f32 to vector<16x1xf32>
    %14 = arith.addf %12, %13 : vector<16x1xf32>
    %15 = tpu.reciprocal %14 {approx = true} : vector<16x1xf32> -> vector<16x1xf32>
    %16 = arith.mulf %14, %15 : vector<16x1xf32>
    %cst_5 = arith.constant 2.000000e+00 : f32
    %17 = vector.broadcast %cst_5 : f32 to vector<16x1xf32>
    %18 = arith.subf %17, %16 : vector<16x1xf32>
    %19 = arith.mulf %15, %18 : vector<16x1xf32>
    %c0_6 = arith.constant 0 : index
    %c0_7 = arith.constant 0 : index
    %20 = vector.load %arg2[%c0_6, %c0_7] : memref<1x32xf32, #tpu.memory_space<vmem>>, vector<1x32xf32>
    %c0_8 = arith.constant 0 : index
    %c0_9 = arith.constant 0 : index
    %21 = vector.load %arg3[%c0_8, %c0_9] : memref<1x32xf32, #tpu.memory_space<vmem>>, vector<1x32xf32>
    %22 = vector.broadcast %20 : vector<1x32xf32> to vector<16x32xf32>
    %23 = arith.mulf %22, %6 : vector<16x32xf32>
    %24 = vector.broadcast %19 : vector<16x1xf32> to vector<16x32xf32>
    %25 = arith.mulf %23, %24 : vector<16x32xf32>
    %26 = vector.broadcast %21 : vector<1x32xf32> to vector<16x32xf32>
    %27 = arith.addf %25, %26 : vector<16x32xf32>
    %c0_10 = arith.constant 0 : index
    %c0_11 = arith.constant 0 : index
    %28 = vector.load %arg4[%c0_10, %c0_11] : memref<16x32xf32, #tpu.memory_space<vmem>>, vector<16x32xf32>
    tpu.vector_store %arg4[%c0_10, %c0_11], %27 {strides = array<i32>} : memref<16x32xf32, #tpu.memory_space<vmem>>, vector<16x32xf32>,
    return
  }
  func.func @transform_0(%arg0: i32) -> (i32, i32) {
    %c0_i32 = arith.constant 0 : i32
    %c0_i32_0 = arith.constant 0 : i32
    return %arg0, %c0_i32 : i32, i32
  }
  func.func @transform_1(%arg0: i32) -> (i32, i32) {
    %c0_i32 = arith.constant 0 : i32
    %c0_i32_0 = arith.constant 0 : i32
    %c0_i32_1 = arith.constant 0 : i32
    return %c0_i32, %c0_i32_0 : i32, i32
  }
  func.func @transform_2(%arg0: i32) -> (i32, i32) {
    %c0_i32 = arith.constant 0 : i32
    %c0_i32_0 = arith.constant 0 : i32
    %c0_i32_1 = arith.constant 0 : i32
    return %c0_i32, %c0_i32_0 : i32, i32
  }
  func.func @transform_3(%arg0: i32) -> (i32, i32) {
    %c0_i32 = arith.constant 0 : i32
    %c0_i32_0 = arith.constant 0 : i32
    return %arg0, %c0_i32 : i32, i32
  }
}

</mosaic_0001>

<bundles_post_ra>
// kernel: tpu_custom_call.1
= control target key start
LH: loop header
LB: loop body
LE: loop exit
PB: predicated region body
PF: predicated region fallthrough
CT: control target
= control target key end

     0   :  { %8 = vsyncpa [#allocation3], 0  ;;  %s302_s0 = inlined_call_operand.hbm [shape: f32[16,32], index: 0, kind: input, shape index: {}]   ;;  %s303_s1 = inlined_call_operand.hbm [shape: f32[1,32], index: 1, kind: input, shape index: {}]   ;;  %s304_s2 = inlined_call_operand.vmem [shape: f32[1,32], index: 2, kind: input, shape index: {}]   ;;  %s305_s3 = inlined_call_operand.hbm [shape: f32[16,32], index: 3, kind: output, shape index: {}]  }
   0x1   :  { %9 = vsyncpa [#allocation6], 0 }
   0x2   :  { %10 = vsyncpa [#allocation4], 0  ;;  %s15_s14 = sshll.u32 %s302_s0, 4  ;;  %s251_s15 = smov [#allocation2]   ;;  %s16_s14 = int_to_ptr.hbm [resolvable:$true] %s15_s14 }
   0x3   :  { %s17_s16 = sshll.u32 %s251_s15, 4  ;;  %s29_s19 = sshll.u32 %s303_s1, 4  ;;  %s18_s16 = int_to_ptr.vmem [resolvable:$true] %s17_s16  ;;  %s30_s19 = int_to_ptr.hbm [resolvable:$true] %s29_s19 }
   0x4   :  { %s252_s20 = smov 128   ;;  %s253_s21 = smov 8  }
   0x5   :  { %23 = dma.hbm_to_vmem [thread:$0]  %s16_s14, 256, %s18_s16, [#allocation3], %s252_s20, %s252_s20, %s253_s21  }
   0x6   :  { %s254_s22 = smov [#allocation5]  }
   0x7   :  { %s31_s23 = sshll.u32 %s254_s22, 4  ;;  %s32_s23 = int_to_ptr.vmem [resolvable:$true] %s31_s23 }
   0x8   :  { %34 = dma.hbm_to_vmem [thread:$0]  %s30_s19, 16, %s32_s23, [#allocation6]  }
   0x9   :  { %245 = dma.done.wait [#allocation3], 256  }
   0xa   :  { %246 = vsyncadd [#allocation3], 4294967040 }
   0xb   :  { %247 = dma.done.wait [#allocation6], 16  }
   0xc   :  { %248 = vsyncadd [#allocation6], 4294967280  ;;  %vm47_vm0 = vcmask 261120   ;;  %v45_v0 = vld [vmem:[#allocation2] sm:$0xff]  ;;  %v46_v2 = vld [vmem:[#allocation2 + $0x8] sm:$0xff]  ;;  %v255_v4 = vmov 32.0  }
   0xd   :  { %v48_v1 = vsel %vm47_vm0, %v45_v0, 0.0  ;;  %v51_v3 = vsel %vm47_vm0, %v46_v2, 0.0  ;;  %161 = vrcp.f32 %v255_v4  ;;  %v256_v21 = vmov 31.0   ;;  %v159_v55 = vld [vmem:[#allocation5] ss:$0 sm:$0xff]  ;;  %s257_s24 = smov [#allocation7]  }
   0xe   :  { %49 = vadd.xlane.f32.xlu0 %v48_v1  ;;  %163 = vrcp.f32 %v256_v21  ;;  %v160_v60 = vld [vmem:[%s304_s2] ss:$0 sm:$0xff]  ;;  %s136_s25 = sshll.u32 %s257_s24, 4  ;;  %s138_s28 = sshll.u32 %s305_s3, 4  ;;  %s137_s25 = int_to_ptr.vmem [resolvable:$true] %s136_s25  ;;  %s139_s28 = int_to_ptr.hbm [resolvable:$true] %s138_s28 }
  0x13   :  { %v162_v5 = vpop.eup %161 }
  0x14   :  { %v55_v6 = vmul.f32 32.0, %v162_v5  ;;  %vm59_vm1 = vweird.f32 %v162_v5  ;;  %v164_v22 = vpop.eup %163 }
  0x15   :  { %v74_v23 = vmul.f32 31.0, %v164_v22  ;;  %vm78_vm2 = vweird.f32 %v164_v22 }
  0x16   :  { %52 = vadd.xlane.f32.xlu0 %v51_v3  ;;  %v56_v7 = vsub.f32 1.0, %v55_v6 }
  0x17   :  { %v75_v24 = vsub.f32 1.0, %v74_v23 }
  0x18   :  { %v57_v8 = vmul.f32 %v162_v5, %v56_v7 }
  0x19   :  { %v76_v25 = vmul.f32 %v164_v22, %v75_v24 }
  0x1a   :  { %v58_v9 = vadd.f32 %v162_v5, %v57_v8 }
  0x1b   :  { %v77_v26 = vadd.f32 %v164_v22, %v76_v25 }
  0x1c   :  { %v60_v10 = vsel %vm59_vm1, %v162_v5, %v58_v9 }
  0x1d   :  { %v79_v27 = vsel %vm78_vm2, %v164_v22, %v77_v26 }
  0x81   :  { %v50_v11 = vpop.xlane.xlu0 %49 }
  0x82   :  { %v61_v12 = vmul.f32 %v60_v10, %v50_v11 }
  0x84   :  { %v63_v13 = vsub.f32 %v45_v0, %v61_v12 }
  0x86   :  { %v65_v14 = vmul.f32 %v63_v13, %v63_v13  ;;  %v121_v58 = vmul.f32 %v159_v55, %v63_v13 }
  0x88   :  { %v67_v15 = vsel %vm47_vm0, %v65_v14, 0.0 }
  0x89   :  { %68 = vadd.xlane.f32.xlu1 %v67_v15  ;;  %v53_v16 = vpop.xlane.xlu0 %52 }
  0x8a   :  { %v62_v17 = vmul.f32 %v60_v10, %v53_v16 }
  0x8c   :  { %v64_v18 = vsub.f32 %v46_v2, %v62_v17 }
  0x8e   :  { %v66_v19 = vmul.f32 %v64_v18, %v64_v18  ;;  %v122_v2 = vmul.f32 %v159_v55, %v64_v18 }
  0x90   :  { %v70_v20 = vsel %vm47_vm0, %v66_v19, 0.0 }
  0x91   :  { %71 = vadd.xlane.f32.xlu1 %v70_v20 }
  0xfc   :  { %v69_v28 = vpop.xlane.xlu1 %68 }
  0xfd   :  { %v80_v29 = vmul.f32 %v79_v27, %v69_v28 }
  0xff   :  { %165 = vrsqrt.f32 %v80_v29  ;;  %vm89_vm3 = vcmp.eq.f32.partialorder %v80_v29, inf  ;;  %v92_v42 = vand.u32 2147483648, %v80_v29  ;;  %vm91_vm4 = vcmp.eq.f32.partialorder %v80_v29, 0.0 }
 0x104   :  { %v72_v30 = vpop.xlane.xlu1 %71 }
 0x105   :  { %v166_v31 = vpop.eup %165  ;;  %v81_v32 = vmul.f32 %v79_v27, %v72_v30 }
 0x106   :  { %v83_v33 = vmul.f32 %v166_v31, %v80_v29 }
 0x107   :  { %167 = vrsqrt.f32 %v81_v32  ;;  %vm101_vm5 = vcmp.eq.f32.partialorder %v81_v32, inf  ;;  %v104_v50 = vand.u32 2147483648, %v81_v32  ;;  %vm103_vm6 = vcmp.eq.f32.partialorder %v81_v32, 0.0 }
 0x108   :  { %v84_v34 = vmul.f32 %v166_v31, %v83_v33 }
 0x10a   :  { %v85_v35 = vmul.f32 0.5, %v84_v34 }
 0x10c   :  { %v86_v36 = vsub.f32 1.5, %v85_v35 }
 0x10d   :  { %v168_v37 = vpop.eup %167 }
 0x10e   :  { %v87_v38 = vmul.f32 %v166_v31, %v86_v36  ;;  %v95_v39 = vmul.f32 %v168_v37, %v81_v32 }
 0x110   :  { %v88_v40 = vmul.f32 %v87_v38, %v80_v29  ;;  %v96_v41 = vmul.f32 %v168_v37, %v95_v39 }
 0x112   :  { %v97_v43 = vmul.f32 0.5, %v96_v41  ;;  %v90_v44 = vsel %vm89_vm3, %v80_v29, %v88_v40 }
 0x113   :  { %v93_v45 = vsel %vm91_vm4, %v92_v42, %v90_v44 }
 0x114   :  { %v98_v46 = vsub.f32 1.5, %v97_v43  ;;  %v106_v47 = vadd.f32 1e-06, %v93_v45 }
 0x116   :  { %v99_v48 = vmul.f32 %v168_v37, %v98_v46  ;;  %169 = vrcp.f32 %v106_v47 }
 0x118   :  { %v100_v49 = vmul.f32 %v99_v48, %v81_v32 }
 0x11a   :  { %v102_v51 = vsel %vm101_vm5, %v81_v32, %v100_v49 }
 0x11b   :  { %v105_v52 = vsel %vm103_vm6, %v104_v50, %v102_v51 }
 0x11c   :  { %v170_v53 = vpop.eup %169  ;;  %v107_v54 = vadd.f32 1e-06, %v105_v52 }
 0x11d   :  { %v110_v56 = vmul.f32 %v170_v53, %v106_v47 }
 0x11e   :  { %171 = vrcp.f32 %v107_v54 }
 0x11f   :  { %v112_v57 = vsub.f32 2.0, %v110_v56 }
 0x121   :  { %v114_v59 = vmul.f32 %v170_v53, %v112_v57 }
 0x123   :  { %v123_v61 = vmul.f32 %v121_v58, %v114_v59 }
 0x124   :  { %v172_v62 = vpop.eup %171 }
 0x125   :  { %v111_v63 = vmul.f32 %v172_v62, %v107_v54  ;;  %v128_v0 = vadd.f32 %v160_v60, %v123_v61 }
 0x127   :  { %v113_v1 = vsub.f32 2.0, %v111_v63  ;;  %130 = vst.msk [vmem:[#allocation7] sm:$0xff] %vm47_vm0, %v128_v0 }
 0x129   :  { %v115_v3 = vmul.f32 %v172_v62, %v113_v1 }
 0x12b   :  { %v124_v4 = vmul.f32 %v122_v2, %v115_v3 }
 0x12d   :  { %v129_v5 = vadd.f32 %v160_v60, %v124_v4 }
 0x12f   :  { %131 = vst.msk [vmem:[#allocation7 + $0x8] sm:$0xff] %vm47_vm0, %v129_v5 }
 0x130   :  { %144 = dma.vmem_to_hbm [thread:$0]  %s137_s25, 256, %s139_s28, [#allocation4], %s252_s20, %s252_s20, %s253_s21  }
 0x131   :  { %249 = dma.done.wait [#allocation4], 256  }
 0x132   :  { %250 = vsyncadd [#allocation4], 4294967040 }
 0x133   :  { %149 = vsyncpa [#allocation3], 1 }
 0x134   :  { %150 = vsyncpa [#allocation6], 1 }
 0x135   :  { %151 = vsyncpa [#allocation4], 1 }

</bundles_post_ra>
